<compile_context>
chip_gen: v7x
topology: tpu7x:2x2x1
jax: 0.10.0
libtpu: 0.0.40
codegen_flags: <defaults>
</compile_context>

<pallas_src>
import functools

import jax
import jax.numpy as jnp
from jax.experimental import pallas as pl
from jax.experimental.pallas import tpu as pltpu

EPS = 1e-5  # PyTorch BatchNorm1d default
_VMEM_LIMIT = 48 * 1024 * 1024  # fits v7x's 64 MiB physical VMEM; plenty of slack on v5e/v6e


def _conv_tile(w_ref, x_ref, h_ref, xcat_ref):
    """Assemble [main | halo] in VMEM and run K shifted MXU dots -> (Cout_p, TL) f32."""
    K = w_ref.shape[0]
    TL = x_ref.shape[-1]
    halo = h_ref.shape[-1]

    xcat_ref[:, :TL] = x_ref[0]                      # (Cin, TL)   main block
    xcat_ref[:, TL:TL + halo] = h_ref[0, 0]          # (Cin, 2p)   halo columns

    conv = jnp.dot(w_ref[0], xcat_ref[:, 0:TL], preferred_element_type=jnp.float32)
    for k in range(1, K):                            # static K -> unrolled
        conv += jnp.dot(w_ref[k], xcat_ref[:, k:k + TL],
                        preferred_element_type=jnp.float32)
    return conv


def _stats_kernel(w_ref, x_ref, h_ref, sum_ref, sq_ref, xcat_ref, *, valid_len):
    """Pass 1: conv tile + per-(sample, channel) sum / sum-of-squares accumulators."""
    @pl.when(pl.program_id(1) == 0)
    def _():
        sum_ref[...] = jnp.zeros_like(sum_ref)
        sq_ref[...] = jnp.zeros_like(sq_ref)

    conv = _conv_tile(w_ref, x_ref, h_ref, xcat_ref)

    # Mask tail columns (output positions >= L): the right-edge taps can reach real
    # samples there, and they must not pollute the batch statistics.
    TL = x_ref.shape[-1]
    pos = pl.program_id(1) * TL + jax.lax.broadcasted_iota(jnp.int32, (1, TL), 1)
    conv = jnp.where(pos < valid_len, conv, 0.0)

    sum_ref[0] += jnp.sum(conv, axis=1, keepdims=True)
    sq_ref[0] += jnp.sum(conv * conv, axis=1, keepdims=True)


def _norm_kernel(w_ref, x_ref, h_ref, scale_ref, shift_ref, o_ref, xcat_ref):
    """Pass 2: recompute conv tile, apply folded BN affine + ReLU, lane-dense NCL store."""
    conv = _conv_tile(w_ref, x_ref, h_ref, xcat_ref)
    y = conv * scale_ref[...] + shift_ref[...]
    o_ref[0] = jnp.maximum(y, 0.0).astype(o_ref.dtype)


@functools.partial(jax.jit, static_argnames=("kernel_size", "tile_l"))
def conv_batch_norm(x_ncl, conv_w, conv_b, bn_gamma, bn_beta, *,
                    kernel_size=3, tile_l=2048):
    """x_ncl: (N, Cin, L) f32. conv_w: (Cout, Cin, K). Returns (N, Cout, L) f32."""
    del conv_b  # cancels exactly: BN subtracts the batch mean right after the conv
    N, Cin, L = x_ncl.shape
    Cout, _, K = conv_w.shape
    assert K == kernel_size
    assert tile_l % 128 == 0
    pad = kernel_size // 2
    halo = 2 * pad

    # Lane-dense tiling along L (per sample). TL is always a multiple of 128.
    TL = max(128, min(tile_l, pl.cdiv(L, 128) * 128))
    num_l = pl.cdiv(L, TL)
    Lp = num_l * TL
    Cout_p = pl.cdiv(Cout, 8) * 8  # sublane-align the f32 output channel dim

    # Channels-first bf16 x, zero-padded per sample: [pad | L real | zeros up to Lp+TL].
    # The extra trailing TL lets every tile's 2*pad halo columns be sliced out cheaply.
    xp = jnp.pad(x_ncl.astype(jnp.bfloat16),
                 ((0, 0), (0, 0), (pad, Lp + TL - pad - L)))          # (N, Cin, Lp+TL)
    x_halo = xp[:, :, TL:TL + Lp].reshape(N, Cin, num_l, TL)[:, :, :, :halo]
    x_halo = jnp.transpose(x_halo, (0, 2, 1, 3))                      # (N, num_l, Cin, 2p)

    # Conv weights as K separate (Cout_p, Cin) taps, bf16.
    w = jnp.transpose(conv_w, (2, 0, 1)).astype(jnp.bfloat16)         # (K, Cout, Cin)
    w = jnp.pad(w, ((0, 0), (0, Cout_p - Cout), (0, 0)))              # (K, Cout_p, Cin)

    grid = (N, num_l)
    w_spec = pl.BlockSpec((K, Cout_p, Cin), lambda n, l: (0, 0, 0))
    x_spec = pl.BlockSpec((1, Cin, TL), lambda n, l: (n, 0, l))
    h_spec = pl.BlockSpec((1, 1, Cin, halo), lambda n, l: (n, l, 0, 0))
    xcat_scratch = pltpu.VMEM((Cin, TL + halo), jnp.bfloat16)

    # ---- pass 1: per-(sample, channel) sum & sum-of-squares (reduction over L) ----
    col_sum, col_sq = pl.pallas_call(
        functools.partial(_stats_kernel, valid_len=L),
        out_shape=(jax.ShapeDtypeStruct((N, Cout_p, 1), jnp.float32),
                   jax.ShapeDtypeStruct((N, Cout_p, 1), jnp.float32)),
        grid=grid,
        in_specs=[w_spec, x_spec, h_spec],
        out_specs=(pl.BlockSpec((1, Cout_p, 1), lambda n, l: (n, 0, 0)),
                   pl.BlockSpec((1, Cout_p, 1), lambda n, l: (n, 0, 0))),
        scratch_shapes=[xcat_scratch],
        compiler_params=pltpu.CompilerParams(
            dimension_semantics=("parallel", "arbitrary"),
            vmem_limit_bytes=_VMEM_LIMIT),
    )(w, xp, x_halo)

    # ---- fold BN (training-mode batch stats) into per-channel scale / shift ----
    count = jnp.float32(N * L)                                  # true element count
    mean = jnp.sum(col_sum, axis=0) / count                     # (Cout_p, 1)
    var = jnp.maximum(jnp.sum(col_sq, axis=0) / count - mean * mean, 0.0)  # biased, fwd
    inv_std = jax.lax.rsqrt(var + EPS)
    gamma = jnp.pad(bn_gamma.astype(jnp.float32), (0, Cout_p - Cout)).reshape(Cout_p, 1)
    beta = jnp.pad(bn_beta.astype(jnp.float32), (0, Cout_p - Cout)).reshape(Cout_p, 1)
    scale = gamma * inv_std                                     # (Cout_p, 1)
    shift = beta - mean * scale                                 # (Cout_p, 1)

    # ---- pass 2: recompute the cheap conv, normalize + ReLU, write NCL directly ----
    out_full = pl.pallas_call(
        _norm_kernel,
        out_shape=jax.ShapeDtypeStruct((N, Cout_p, Lp), jnp.float32),
        grid=grid,
        in_specs=[w_spec, x_spec, h_spec,
                  pl.BlockSpec((Cout_p, 1), lambda n, l: (0, 0)),
                  pl.BlockSpec((Cout_p, 1), lambda n, l: (0, 0))],
        out_specs=pl.BlockSpec((1, Cout_p, TL), lambda n, l: (n, 0, l)),
        scratch_shapes=[xcat_scratch],
        compiler_params=pltpu.CompilerParams(
            dimension_semantics=("parallel", "parallel"),
            vmem_limit_bytes=_VMEM_LIMIT),
    )(w, xp, x_halo, scale, shift)

    # Already (N, Cout_p, Lp) in NCL layout; slice off channel/length padding (no-op
    # when Cout % 8 == 0 and L % TL == 0).
    return out_full[:, :Cout, :L]


def _reference(x_ncl, conv_w, conv_b, bn_gamma, bn_beta):
    """Pure-JAX reference matching PyTorch Conv1d + BatchNorm1d(train) + ReLU."""
    K = conv_w.shape[-1]
    pad = K // 2
    conv = jax.lax.conv_general_dilated(
        x_ncl, conv_w, window_strides=(1,), padding=((pad, pad),),
        dimension_numbers=("NCH", "OIH", "NCH"))
    conv = conv + conv_b[None, :, None]
    mean = jnp.mean(conv, axis=(0, 2), keepdims=True)
    var = jnp.mean((conv - mean) ** 2, axis=(0, 2), keepdims=True)
    y = (conv - mean) * jax.lax.rsqrt(var + EPS)
    y = y * bn_gamma[None, :, None] + bn_beta[None, :, None]
    return jnp.maximum(y, 0.0)


if __name__ == "__main__":
    # Small shapes consistent with nn.Conv1d(num_channels, out_channels, k=3, pad=1).
    N, Cin, L = 2, 4, 16
    Cout, K = 8, 3

    key = jax.random.PRNGKey(0)
    kx, kw, kb, kg, kbt = jax.random.split(key, 5)

    x = jax.random.normal(kx, (N, Cin, L), dtype=jnp.float32)
    conv_w = 0.1 * jax.random.normal(kw, (Cout, Cin, K), dtype=jnp.float32)
    conv_b = 0.1 * jax.random.normal(kb, (Cout,), dtype=jnp.float32)
    bn_gamma = 1.0 + 0.1 * jax.random.normal(kg, (Cout,), dtype=jnp.float32)
    bn_beta = 0.1 * jax.random.normal(kbt, (Cout,), dtype=jnp.float32)

    out = conv_batch_norm(x, conv_w, conv_b, bn_gamma, bn_beta, kernel_size=K)
    out = jax.block_until_ready(out)
    assert out.shape == (N, Cout, L), out.shape

    # Check 1: reference fed the same bf16-quantized conv operands (isolates kernel
    # structure from mixed-precision quantization) -> tight tolerance.
    x_q = x.astype(jnp.bfloat16).astype(jnp.float32)
    w_q = conv_w.astype(jnp.bfloat16).astype(jnp.float32)
    ref_q = _reference(x_q, w_q, conv_b, bn_gamma, bn_beta)
    assert jnp.allclose(out, ref_q, atol=1e-4, rtol=1e-4), \
        float(jnp.max(jnp.abs(out - ref_q)))

    # Check 2: full f32 PyTorch semantics -> bf16-matmul-level tolerance.
    ref = _reference(x, conv_w, conv_b, bn_gamma, bn_beta)
    assert jnp.allclose(out, ref, atol=3e-2, rtol=3e-2), \
        float(jnp.max(jnp.abs(out - ref)))

    print("KERNEL_OK")
</pallas_src>

<mosaic_0001>
module attributes {stable_mosaic.version = 11 : i64} {
  func.func @_stats_kernel(%arg0: i32, %arg1: i32, %arg2: memref<3x8x4xbf16, #tpu.memory_space<vmem>>, %arg3: memref<1x4x128xbf16, #tpu.memory_space<vmem>>, %arg4: memref<1x1x4x2xbf16, #tpu.memory_space<vmem>>, %arg5: memref<1x8x1xf32, #tpu.memory_space<vmem>>, %arg6: memref<1x8x1xf32, #tpu.memory_space<vmem>>, %arg7: memref<4x130xbf16, #tpu.memory_space<vmem>>) attributes {dimension_semantics = [#tpu.dimension_semantics<parallel>, #tpu.dimension_semantics<arbitrary>], iteration_bounds = array<i64: 2, 1>, scalar_prefetch = 0 : i64, scratch_operands = 1 : i64, tpu.core_type = #tpu.core_type<tc>, window_params = [{pipeline_mode = #tpu.pipeline_mode<synchronous>, transform_indices = @transform_0, window_bounds = array<i64: 3, 8, 4>}, {transform_indices = @transform_1, window_bounds = array<i64: 1, 4, 128>}, {transform_indices = @transform_2, window_bounds = array<i64: 1, 1, 4, 2>}, {transform_indices = @transform_3, window_bounds = array<i64: 1, 8, 1>}, {transform_indices = @transform_4, window_bounds = array<i64: 1, 8, 1>}]} {
    %c0_i32 = arith.constant 0 : i32
    %0 = arith.cmpi eq, %arg1, %c0_i32 : i32
    %1 = arith.extui %0 : i1 to i32
    %c0_i32_0 = arith.constant 0 : i32
    %2 = arith.cmpi ne, %1, %c0_i32_0 : i32
    scf.if %2 {
      %cst_40 = arith.constant 0.000000e+00 : f32
      %50 = vector.broadcast %cst_40 : f32 to vector<1x8x1xf32>
      %c0_41 = arith.constant 0 : index
      %c0_42 = arith.constant 0 : index
      %c0_43 = arith.constant 0 : index
      %51 = vector.load %arg5[%c0_41, %c0_42, %c0_43] : memref<1x8x1xf32, #tpu.memory_space<vmem>>, vector<1x8x1xf32>
      tpu.vector_store %arg5[%c0_41, %c0_42, %c0_43], %50 {strides = array<i32>} : memref<1x8x1xf32, #tpu.memory_space<vmem>>, vector<1x8x1xf32>,
      %cst_44 = arith.constant 0.000000e+00 : f32
      %52 = vector.broadcast %cst_44 : f32 to vector<1x8x1xf32>
      %c0_45 = arith.constant 0 : index
      %c0_46 = arith.constant 0 : index
      %c0_47 = arith.constant 0 : index
      %53 = vector.load %arg6[%c0_45, %c0_46, %c0_47] : memref<1x8x1xf32, #tpu.memory_space<vmem>>, vector<1x8x1xf32>
      tpu.vector_store %arg6[%c0_45, %c0_46, %c0_47], %52 {strides = array<i32>} : memref<1x8x1xf32, #tpu.memory_space<vmem>>, vector<1x8x1xf32>,
    } else {
    }
    %c0 = arith.constant 0 : index
    %c0_1 = arith.constant 0 : index
    %c0_2 = arith.constant 0 : index
    %3 = vector.load %arg3[%c0, %c0_1, %c0_2] : memref<1x4x128xbf16, #tpu.memory_space<vmem>>, vector<1x4x128xbf16>
    %4 = vector.shape_cast %3 : vector<1x4x128xbf16> to vector<4x128xbf16>
    %c0_3 = arith.constant 0 : index
    %c0_4 = arith.constant 0 : index
    %5 = vector.load %arg7[%c0_3, %c0_4] : memref<4x130xbf16, #tpu.memory_space<vmem>>, vector<4x128xbf16>
    tpu.vector_store %arg7[%c0_3, %c0_4], %4 {strides = array<i32>} : memref<4x130xbf16, #tpu.memory_space<vmem>>, vector<4x128xbf16>,
    %c0_5 = arith.constant 0 : index
    %c0_6 = arith.constant 0 : index
    %c0_7 = arith.constant 0 : index
    %c0_8 = arith.constant 0 : index
    %6 = vector.load %arg4[%c0_5, %c0_6, %c0_7, %c0_8] : memref<1x1x4x2xbf16, #tpu.memory_space<vmem>>, vector<1x1x4x2xbf16>
    %7 = vector.shape_cast %6 : vector<1x1x4x2xbf16> to vector<4x2xbf16>
    %c0_9 = arith.constant 0 : index
    %c128 = arith.constant 128 : index
    %8 = vector.load %arg7[%c0_9, %c128] : memref<4x130xbf16, #tpu.memory_space<vmem>>, vector<4x2xbf16>
    tpu.vector_store %arg7[%c0_9, %c128], %7 {strides = array<i32>} : memref<4x130xbf16, #tpu.memory_space<vmem>>, vector<4x2xbf16>,
    %c0_10 = arith.constant 0 : index
    %c0_11 = arith.constant 0 : index
    %c0_12 = arith.constant 0 : index
    %9 = vector.load %arg2[%c0_10, %c0_11, %c0_12] : memref<3x8x4xbf16, #tpu.memory_space<vmem>>, vector<1x8x4xbf16>
    %10 = vector.shape_cast %9 : vector<1x8x4xbf16> to vector<8x4xbf16>
    %c0_13 = arith.constant 0 : index
    %c0_14 = arith.constant 0 : index
    %11 = vector.load %arg7[%c0_13, %c0_14] : memref<4x130xbf16, #tpu.memory_space<vmem>>, vector<4x128xbf16>
    %cst = arith.constant dense<0.000000e+00> : vector<8x128xf32>
    %12 = tpu.matmul %10, %11, %cst {dimension_numbers = #tpu.dot_dimension_numbers<[1], [0], [0], [1], [0, 0, 1, 1], [], []>} : vector<8x4xbf16>, vector<4x128xbf16>, vector<8x128xf32> -> vector<8x128xf32>
    %c1 = arith.constant 1 : index
    %c0_15 = arith.constant 0 : index
    %c0_16 = arith.constant 0 : index
    %13 = vector.load %arg2[%c1, %c0_15, %c0_16] : memref<3x8x4xbf16, #tpu.memory_space<vmem>>, vector<1x8x4xbf16>
    %14 = vector.shape_cast %13 : vector<1x8x4xbf16> to vector<8x4xbf16>
    %c0_17 = arith.constant 0 : index
    %c1_18 = arith.constant 1 : index
    %15 = vector.load %arg7[%c0_17, %c1_18] : memref<4x130xbf16, #tpu.memory_space<vmem>>, vector<4x128xbf16>
    %cst_19 = arith.constant dense<0.000000e+00> : vector<8x128xf32>
    %16 = tpu.matmul %14, %15, %cst_19 {dimension_numbers = #tpu.dot_dimension_numbers<[1], [0], [0], [1], [0, 0, 1, 1], [], []>} : vector<8x4xbf16>, vector<4x128xbf16>, vector<8x128xf32> -> vector<8x128xf32>
    %17 = arith.addf %12, %16 : vector<8x128xf32>
    %c2 = arith.constant 2 : index
    %c0_20 = arith.constant 0 : index
    %c0_21 = arith.constant 0 : index
    %18 = vector.load %arg2[%c2, %c0_20, %c0_21] : memref<3x8x4xbf16, #tpu.memory_space<vmem>>, vector<1x8x4xbf16>
    %19 = vector.shape_cast %18 : vector<1x8x4xbf16> to vector<8x4xbf16>
    %c0_22 = arith.constant 0 : index
    %c2_23 = arith.constant 2 : index
    %20 = vector.load %arg7[%c0_22, %c2_23] : memref<4x130xbf16, #tpu.memory_space<vmem>>, vector<4x128xbf16>
    %cst_24 = arith.constant dense<0.000000e+00> : vector<8x128xf32>
    %21 = tpu.matmul %19, %20, %cst_24 {dimension_numbers = #tpu.dot_dimension_numbers<[1], [0], [0], [1], [0, 0, 1, 1], [], []>} : vector<8x4xbf16>, vector<4x128xbf16>, vector<8x128xf32> -> vector<8x128xf32>
    %22 = arith.addf %17, %21 : vector<8x128xf32>
    %c128_i32 = arith.constant 128 : i32
    %23 = arith.muli %arg1, %c128_i32 : i32
    %24 = tpu.iota {dimensions = array<i32: 1>} : vector<1x128xi32>
    %25 = vector.broadcast %23 : i32 to vector<1x128xi32>
    %26 = arith.addi %25, %24 : vector<1x128xi32>
    %c16_i32 = arith.constant 16 : i32
    %27 = vector.broadcast %c16_i32 : i32 to vector<1x128xi32>
    %28 = arith.cmpi slt, %26, %27 : vector<1x128xi32>
    %cst_25 = arith.constant 0.000000e+00 : f32
    %29 = vector.shape_cast %28 : vector<1x128xi1> to vector<1x128xi1>
    %30 = vector.broadcast %29 : vector<1x128xi1> to vector<8x128xi1>
    %31 = vector.broadcast %cst_25 : f32 to vector<8x128xf32>
    %32 = arith.select %30, %22, %31 : vector<8x128xi1>, vector<8x128xf32>
    %c0_26 = arith.constant 0 : index
    %c0_27 = arith.constant 0 : index
    %c0_28 = arith.constant 0 : index
    %33 = vector.load %arg5[%c0_26, %c0_27, %c0_28] : memref<1x8x1xf32, #tpu.memory_space<vmem>>, vector<1x8x1xf32>
    %34 = vector.shape_cast %33 : vector<1x8x1xf32> to vector<8x1xf32>
    %cst_29 = arith.constant dense<0.000000e+00> : vector<8xf32>
    %35 = vector.multi_reduction <add>, %32, %cst_29 [1] : vector<8x128xf32> to vector<8xf32>
    %36 = vector.shape_cast %35 : vector<8xf32> to vector<8x1xf32>
    %37 = arith.addf %34, %36 : vector<8x1xf32>
    %c0_30 = arith.constant 0 : index
    %c0_31 = arith.constant 0 : index
    %c0_32 = arith.constant 0 : index
    %38 = vector.load %arg5[%c0_30, %c0_31, %c0_32] : memref<1x8x1xf32, #tpu.memory_space<vmem>>, vector<1x8x1xf32>
    %39 = vector.shape_cast %38 : vector<1x8x1xf32> to vector<8x1xf32>
    %40 = vector.shape_cast %37 : vector<8x1xf32> to vector<1x8x1xf32>
    tpu.vector_store %arg5[%c0_30, %c0_31, %c0_32], %40 {strides = array<i32>} : memref<1x8x1xf32, #tpu.memory_space<vmem>>, vector<1x8x1xf32>,
    %c0_33 = arith.constant 0 : index
    %c0_34 = arith.constant 0 : index
    %c0_35 = arith.constant 0 : index
    %41 = vector.load %arg6[%c0_33, %c0_34, %c0_35] : memref<1x8x1xf32, #tpu.memory_space<vmem>>, vector<1x8x1xf32>
    %42 = vector.shape_cast %41 : vector<1x8x1xf32> to vector<8x1xf32>
    %43 = arith.mulf %32, %32 : vector<8x128xf32>
    %cst_36 = arith.constant dense<0.000000e+00> : vector<8xf32>
    %44 = vector.multi_reduction <add>, %43, %cst_36 [1] : vector<8x128xf32> to vector<8xf32>
    %45 = vector.shape_cast %44 : vector<8xf32> to vector<8x1xf32>
    %46 = arith.addf %42, %45 : vector<8x1xf32>
    %c0_37 = arith.constant 0 : index
    %c0_38 = arith.constant 0 : index
    %c0_39 = arith.constant 0 : index
    %47 = vector.load %arg6[%c0_37, %c0_38, %c0_39] : memref<1x8x1xf32, #tpu.memory_space<vmem>>, vector<1x8x1xf32>
    %48 = vector.shape_cast %47 : vector<1x8x1xf32> to vector<8x1xf32>
    %49 = vector.shape_cast %46 : vector<8x1xf32> to vector<1x8x1xf32>
    tpu.vector_store %arg6[%c0_37, %c0_38, %c0_39], %49 {strides = array<i32>} : memref<1x8x1xf32, #tpu.memory_space<vmem>>, vector<1x8x1xf32>,
    return
  }
  func.func @transform_0(%arg0: i32, %arg1: i32) -> (i32, i32, i32) {
    %c0_i32 = arith.constant 0 : i32
    %c0_i32_0 = arith.constant 0 : i32
    %c0_i32_1 = arith.constant 0 : i32
    %c0_i32_2 = arith.constant 0 : i32
    return %c0_i32, %c0_i32_0, %c0_i32_1 : i32, i32, i32
  }
  func.func @transform_1(%arg0: i32, %arg1: i32) -> (i32, i32, i32) {
    %c0_i32 = arith.constant 0 : i32
    %c0_i32_0 = arith.constant 0 : i32
    return %arg0, %c0_i32, %arg1 : i32, i32, i32
  }
  func.func @transform_2(%arg0: i32, %arg1: i32) -> (i32, i32, i32, i32) {
    %c0_i32 = arith.constant 0 : i32
    %c0_i32_0 = arith.constant 0 : i32
    %c0_i32_1 = arith.constant 0 : i32
    return %arg0, %arg1, %c0_i32, %c0_i32_0 : i32, i32, i32, i32
  }
  func.func @transform_3(%arg0: i32, %arg1: i32) -> (i32, i32, i32) {
    %c0_i32 = arith.constant 0 : i32
    %c0_i32_0 = arith.constant 0 : i32
    %c0_i32_1 = arith.constant 0 : i32
    return %arg0, %c0_i32, %c0_i32_0 : i32, i32, i32
  }
  func.func @transform_4(%arg0: i32, %arg1: i32) -> (i32, i32, i32) {
    %c0_i32 = arith.constant 0 : i32
    %c0_i32_0 = arith.constant 0 : i32
    %c0_i32_1 = arith.constant 0 : i32
    return %arg0, %c0_i32, %c0_i32_0 : i32, i32, i32
  }
}

module attributes {stable_mosaic.version = 11 : i64} {
  func.func @_norm_kernel(%arg0: i32, %arg1: i32, %arg2: memref<3x8x4xbf16, #tpu.memory_space<vmem>>, %arg3: memref<1x4x128xbf16, #tpu.memory_space<vmem>>, %arg4: memref<1x1x4x2xbf16, #tpu.memory_space<vmem>>, %arg5: memref<8x1xf32, #tpu.memory_space<vmem>>, %arg6: memref<8x1xf32, #tpu.memory_space<vmem>>, %arg7: memref<1x8x128xf32, #tpu.memory_space<vmem>>, %arg8: memref<4x130xbf16, #tpu.memory_space<vmem>>) attributes {dimension_semantics = [#tpu.dimension_semantics<parallel>, #tpu.dimension_semantics<parallel>], iteration_bounds = array<i64: 2, 1>, scalar_prefetch = 0 : i64, scratch_operands = 1 : i64, tpu.core_type = #tpu.core_type<tc>, window_params = [{pipeline_mode = #tpu.pipeline_mode<synchronous>, transform_indices = @transform_0, window_bounds = array<i64: 3, 8, 4>}, {transform_indices = @transform_1, window_bounds = array<i64: 1, 4, 128>}, {transform_indices = @transform_2, window_bounds = array<i64: 1, 1, 4, 2>}, {pipeline_mode = #tpu.pipeline_mode<synchronous>, transform_indices = @transform_3, window_bounds = array<i64: 8, 1>}, {pipeline_mode = #tpu.pipeline_mode<synchronous>, transform_indices = @transform_4, window_bounds = array<i64: 8, 1>}, {transform_indices = @transform_5, window_bounds = array<i64: 1, 8, 128>}]} {
    %c0 = arith.constant 0 : index
    %c0_0 = arith.constant 0 : index
    %c0_1 = arith.constant 0 : index
    %0 = vector.load %arg3[%c0, %c0_0, %c0_1] : memref<1x4x128xbf16, #tpu.memory_space<vmem>>, vector<1x4x128xbf16>
    %1 = vector.shape_cast %0 : vector<1x4x128xbf16> to vector<4x128xbf16>
    %c0_2 = arith.constant 0 : index
    %c0_3 = arith.constant 0 : index
    %2 = vector.load %arg8[%c0_2, %c0_3] : memref<4x130xbf16, #tpu.memory_space<vmem>>, vector<4x128xbf16>
    tpu.vector_store %arg8[%c0_2, %c0_3], %1 {strides = array<i32>} : memref<4x130xbf16, #tpu.memory_space<vmem>>, vector<4x128xbf16>,
    %c0_4 = arith.constant 0 : index
    %c0_5 = arith.constant 0 : index
    %c0_6 = arith.constant 0 : index
    %c0_7 = arith.constant 0 : index
    %3 = vector.load %arg4[%c0_4, %c0_5, %c0_6, %c0_7] : memref<1x1x4x2xbf16, #tpu.memory_space<vmem>>, vector<1x1x4x2xbf16>
    %4 = vector.shape_cast %3 : vector<1x1x4x2xbf16> to vector<4x2xbf16>
    %c0_8 = arith.constant 0 : index
    %c128 = arith.constant 128 : index
    %5 = vector.load %arg8[%c0_8, %c128] : memref<4x130xbf16, #tpu.memory_space<vmem>>, vector<4x2xbf16>
    tpu.vector_store %arg8[%c0_8, %c128], %4 {strides = array<i32>} : memref<4x130xbf16, #tpu.memory_space<vmem>>, vector<4x2xbf16>,
    %c0_9 = arith.constant 0 : index
    %c0_10 = arith.constant 0 : index
    %c0_11 = arith.constant 0 : index
    %6 = vector.load %arg2[%c0_9, %c0_10, %c0_11] : memref<3x8x4xbf16, #tpu.memory_space<vmem>>, vector<1x8x4xbf16>
    %7 = vector.shape_cast %6 : vector<1x8x4xbf16> to vector<8x4xbf16>
    %c0_12 = arith.constant 0 : index
    %c0_13 = arith.constant 0 : index
    %8 = vector.load %arg8[%c0_12, %c0_13] : memref<4x130xbf16, #tpu.memory_space<vmem>>, vector<4x128xbf16>
    %cst = arith.constant dense<0.000000e+00> : vector<8x128xf32>
    %9 = tpu.matmul %7, %8, %cst {dimension_numbers = #tpu.dot_dimension_numbers<[1], [0], [0], [1], [0, 0, 1, 1], [], []>} : vector<8x4xbf16>, vector<4x128xbf16>, vector<8x128xf32> -> vector<8x128xf32>
    %c1 = arith.constant 1 : index
    %c0_14 = arith.constant 0 : index
    %c0_15 = arith.constant 0 : index
    %10 = vector.load %arg2[%c1, %c0_14, %c0_15] : memref<3x8x4xbf16, #tpu.memory_space<vmem>>, vector<1x8x4xbf16>
    %11 = vector.shape_cast %10 : vector<1x8x4xbf16> to vector<8x4xbf16>
    %c0_16 = arith.constant 0 : index
    %c1_17 = arith.constant 1 : index
    %12 = vector.load %arg8[%c0_16, %c1_17] : memref<4x130xbf16, #tpu.memory_space<vmem>>, vector<4x128xbf16>
    %cst_18 = arith.constant dense<0.000000e+00> : vector<8x128xf32>
    %13 = tpu.matmul %11, %12, %cst_18 {dimension_numbers = #tpu.dot_dimension_numbers<[1], [0], [0], [1], [0, 0, 1, 1], [], []>} : vector<8x4xbf16>, vector<4x128xbf16>, vector<8x128xf32> -> vector<8x128xf32>
    %14 = arith.addf %9, %13 : vector<8x128xf32>
    %c2 = arith.constant 2 : index
    %c0_19 = arith.constant 0 : index
    %c0_20 = arith.constant 0 : index
    %15 = vector.load %arg2[%c2, %c0_19, %c0_20] : memref<3x8x4xbf16, #tpu.memory_space<vmem>>, vector<1x8x4xbf16>
    %16 = vector.shape_cast %15 : vector<1x8x4xbf16> to vector<8x4xbf16>
    %c0_21 = arith.constant 0 : index
    %c2_22 = arith.constant 2 : index
    %17 = vector.load %arg8[%c0_21, %c2_22] : memref<4x130xbf16, #tpu.memory_space<vmem>>, vector<4x128xbf16>
    %cst_23 = arith.constant dense<0.000000e+00> : vector<8x128xf32>
    %18 = tpu.matmul %16, %17, %cst_23 {dimension_numbers = #tpu.dot_dimension_numbers<[1], [0], [0], [1], [0, 0, 1, 1], [], []>} : vector<8x4xbf16>, vector<4x128xbf16>, vector<8x128xf32> -> vector<8x128xf32>
    %19 = arith.addf %14, %18 : vector<8x128xf32>
    %c0_24 = arith.constant 0 : index
    %c0_25 = arith.constant 0 : index
    %20 = vector.load %arg5[%c0_24, %c0_25] : memref<8x1xf32, #tpu.memory_space<vmem>>, vector<8x1xf32>
    %21 = vector.broadcast %20 : vector<8x1xf32> to vector<8x128xf32>
    %22 = arith.mulf %19, %21 : vector<8x128xf32>
    %c0_26 = arith.constant 0 : index
    %c0_27 = arith.constant 0 : index
    %23 = vector.load %arg6[%c0_26, %c0_27] : memref<8x1xf32, #tpu.memory_space<vmem>>, vector<8x1xf32>
    %24 = vector.broadcast %23 : vector<8x1xf32> to vector<8x128xf32>
    %25 = arith.addf %22, %24 : vector<8x128xf32>
    %cst_28 = arith.constant 0.000000e+00 : f32
    %26 = vector.broadcast %cst_28 : f32 to vector<8x128xf32>
    %27 = arith.maximumf %25, %26 : vector<8x128xf32>
    %c0_29 = arith.constant 0 : index
    %c0_30 = arith.constant 0 : index
    %c0_31 = arith.constant 0 : index
    %28 = vector.load %arg7[%c0_29, %c0_30, %c0_31] : memref<1x8x128xf32, #tpu.memory_space<vmem>>, vector<1x8x128xf32>
    %29 = vector.shape_cast %28 : vector<1x8x128xf32> to vector<8x128xf32>
    %30 = vector.shape_cast %27 : vector<8x128xf32> to vector<1x8x128xf32>
    tpu.vector_store %arg7[%c0_29, %c0_30, %c0_31], %30 {strides = array<i32>} : memref<1x8x128xf32, #tpu.memory_space<vmem>>, vector<1x8x128xf32>,
    return
  }
  func.func @transform_0(%arg0: i32, %arg1: i32) -> (i32, i32, i32) {
    %c0_i32 = arith.constant 0 : i32
    %c0_i32_0 = arith.constant 0 : i32
    %c0_i32_1 = arith.constant 0 : i32
    %c0_i32_2 = arith.constant 0 : i32
    return %c0_i32, %c0_i32_0, %c0_i32_1 : i32, i32, i32
  }
  func.func @transform_1(%arg0: i32, %arg1: i32) -> (i32, i32, i32) {
    %c0_i32 = arith.constant 0 : i32
    %c0_i32_0 = arith.constant 0 : i32
    return %arg0, %c0_i32, %arg1 : i32, i32, i32
  }
  func.func @transform_2(%arg0: i32, %arg1: i32) -> (i32, i32, i32, i32) {
    %c0_i32 = arith.constant 0 : i32
    %c0_i32_0 = arith.constant 0 : i32
    %c0_i32_1 = arith.constant 0 : i32
    return %arg0, %arg1, %c0_i32, %c0_i32_0 : i32, i32, i32, i32
  }
  func.func @transform_3(%arg0: i32, %arg1: i32) -> (i32, i32) {
    %c0_i32 = arith.constant 0 : i32
    %c0_i32_0 = arith.constant 0 : i32
    %c0_i32_1 = arith.constant 0 : i32
    return %c0_i32, %c0_i32_0 : i32, i32
  }
  func.func @transform_4(%arg0: i32, %arg1: i32) -> (i32, i32) {
    %c0_i32 = arith.constant 0 : i32
    %c0_i32_0 = arith.constant 0 : i32
    %c0_i32_1 = arith.constant 0 : i32
    return %c0_i32, %c0_i32_0 : i32, i32
  }
  func.func @transform_5(%arg0: i32, %arg1: i32) -> (i32, i32, i32) {
    %c0_i32 = arith.constant 0 : i32
    %c0_i32_0 = arith.constant 0 : i32
    return %arg0, %c0_i32, %arg1 : i32, i32, i32
  }
}

</mosaic_0001>

<bundles_post_ra>
// kernel: conv_batch_norm.3
= control target key start
LH: loop header
LB: loop body
LE: loop exit
PB: predicated region body
PF: predicated region fallthrough
CT: control target
= control target key end

     0   :  { %10 = vsyncpa [#allocation4], 0  ;;  %s948_s0 = inlined_call_operand.vmem [shape: bf16[3,8,4], index: 0, kind: input, shape index: {}]   ;;  %s949_s1 = inlined_call_operand.vmem [shape: bf16[2,4,256], index: 1, kind: input, shape index: {}]   ;;  %s950_s2 = inlined_call_operand.vmem [shape: bf16[2,1,4,2], index: 2, kind: input, shape index: {}]   ;;  %s951_s3 = inlined_call_operand.vmem [shape: f32[8,1], index: 3, kind: input, shape index: {}]   ;;  %s952_s4 = inlined_call_operand.vmem [shape: f32[8,1], index: 4, kind: input, shape index: {}]   ;;  %s953_s5 = inlined_call_operand.hbm [shape: f32[2,8,128], index: 5, kind: output, shape index: {}]  }
   0x1   :  { %12 = vsyncpa [#allocation4 + $0x1], 0  ;;  %s809_s18 = smov 0   ;;  %s811_s19 = smov 0  }
   0x2   :  { %s813_s20 = smov 0   ;;  %s815_s21 = smov 0  }
   0x3   :  { %s817_s22 = smov 0   ;;  %s819_s23 = smov 0  }
   0x4 LB: > { %s581_s24 = sadd.s32 4294967295, %s771_s23   ;;  %s582_s25 = sadd.s32 4294967294, %s771_s23   ;;  %s771_s23 = sphi %s819_s23, %s18_s23   ;;  %s767_s22 = sphi %s817_s22, %s960_s22   ;;  %s763_s21 = sphi %s815_s21, %s959_s21   ;;  %s759_s20 = sphi %s813_s20, %s958_s20   ;;  %s755_s19 = sphi %s811_s19, %s957_s19   ;;  %s751_s18 = sphi %s809_s18, %s956_s18  }
   0x5   : > { %s30_s26 = sadd.s32 1, %s767_s22  ;;  %s158_s27 = sadd.s32 1, %s759_s20 }
   0x6   : > { %p32_p0 = scmp.ge.s32.totalorder %s30_s26, 2  ;;  %p168_p1 = scmp.ne.s32.totalorder %s759_s20, %s755_s19 }
   0x7   : > { %p169_p2 = scmp.eq.s32.totalorder %s581_s24, 1  ;;  %p174_p3 = scmp.ne.s32.totalorder %s755_s19, %s751_s18 }
   0x8   : > { %s962_s26 = smov (%p32_p0, %s30_s26), 0  ;;  %p175_p5 = scmp.eq.s32.totalorder %s582_s25, 1 }
   0x9   : > { %p849_p4 = por %p169_p2, %p168_p1  ;;  %s153_s29 = ssub.s32 %s767_s22, %s962_s26 }
   0xa   : > { %p585_p6 = scmp.ge.s32.totalorder %s771_s23, 1  ;;  %p156_p7 = scmp.eq.s32.totalorder %s153_s29, 0 }
   0xb   : > { %p856_p8 = por %p175_p5, %p174_p3  ;;  %p223_p9 = scmp.lt.s32.totalorder %s771_s23, 3 }
   0xc   : > { %s862_s6 = scalar_select %p156_p7, %s759_s20, %s158_s27  }
   0xd   : > { %p224_p10 = pnand %p585_p6, %p223_p9 }
   0xe   : > { %p261_p11 = scmp.lt.s32.totalorder (!%p224_p10), %s763_s21, 1  ;;  %v773_v0 = vmov (!%p224_p10), 0.0   ;;  %vm774_vm0 = vmmov (!%p224_p10), 0   ;;  %vm280_vm1 = vcmask (!%p224_p10), 9216   ;;  %vm306_vm2 = vcmask (!%p224_p10), 1041408   ;;  %s776_s16 = smov (!%p224_p10), 126  }
   0xf   : > { %227 = sbr.rel (%p224_p10) target bundleno = 394 (0x18a), region = 40  ;;  %614 = vmatprep.subr.bf16.mxu0 (!%p224_p10), %v773_v0  ;;  %616 = vmatprep.mubr.msk.bf16.mxu0 (!%p224_p10), %vm774_vm0, %v773_v0  ;;  %v775_v3 = vmov (!%p224_p10), 0   ;;  %s777_s17 = smov (!%p224_p10), 127   ;;  %v282_v8 = vld [vmem:[%s948_s0] sm:$0xf] (!%p224_p10)  ;;  %vm302_vm3 = vcmask (!%p224_p10), 31744  }
  0x10   : > { %608 = vmatprep.subr.bf16.mxu1 (!%p224_p10), %v773_v0  ;;  %610 = vmatprep.mubr.msk.bf16.mxu1 (!%p224_p10), %vm774_vm0, %v773_v0  ;;  %v461_v9 = vld [vmem:[%s951_s3] sm:$0xff] (!%p224_p10)  ;;  %vm412_vm4 = vcmask (!%p224_p10), 1031168   ;;  %vm300_vm5 = vcmask (!%p224_p10), 1039360   ;;  %v594_v20 = vld [vmem:[%s948_s0 + $0x8] sm:$0xf] (!%p224_p10)  ;;  %s258_s13 = sand.u32 (!%p224_p10), 1, %s755_s19  }
  0x11   : > { %691 = vset.pattern.permute.xlu0 (!%p224_p10), %v775_v3  ;;  %692 = vset.pattern.permute.xlu1 (!%p224_p10), %v775_v3  ;;  %v468_v10 = vld [vmem:[%s952_s4] sm:$0xff] (!%p224_p10)  ;;  %s586_s14 = sshll.u32 (!%p224_p10), %s258_s13, 3  ;;  %s478_s29 = scalar_lea.sflag (!%p224_p10), [#allocation4], %s258_s13 }
  0x12   : > { %v590_v19 = vld [vmem:[%s948_s0 + $0x4] sm:$0xf] (!%p224_p10) }
  0x16   : > { %s262_s7 = scalar_select %p261_p11, %s763_s21, 1 }
  0x18   : > { %s601_s8 = sshll.u32 %s262_s7, 2  ;;  %s589_s9 = sshll.u32 %s262_s7, 1 }
  0x19   : > { %s268_s12 = scalar_lea.vmem %s949_s1, %s601_s8  ;;  %s275_s15 = scalar_lea.vmem %s950_s2, %s589_s9 }
  0x1a   : > { %v277_v1 = vld [vmem:[%s268_s12] sm:$0x3] }
  0x1b   : > { %v279_v2 = vld [vmem:[%s275_s15] sm:$0x3]  ;;  %278 = vst [vmem:[#allocation2] sm:$0x3] %v277_v1  ;;  %s598_s15 = sshll.u32 %s763_s21, 7  ;;  %s778_s21 = smov [#allocation3]  }
  0x1c   : > { %281 = vst.msk [vmem:[#allocation2 + $0x2] sm:$0x3] %vm280_vm1, %v279_v2  ;;  %s901_s27 = scalar_lea.hbm %s953_s5, %s598_s15  ;;  %s697_s8 = sshll.u32 %s778_s21, 4  ;;  %s698_s8 = int_to_ptr.vmem [resolvable:$false] %s697_s8 }
  0x1d   : > { %s699_s9 = scalar_lea.vmem %s698_s8, 256 }
  0x22   : > { %v283_v5 = vld [vmem:[#allocation2] sm:$0x3] }
  0x23   : > { %v595_v4 = vld.sshfl [vmem:[#allocation2] sm:$0x33 pattern:$0x76325410]  ;;  %v354_v7 = vsel %vm306_vm2, %v283_v5, 0 }
  0x24   : > { %408 = vrot.lane.b32.xlu1 %v595_v4, %s776_s16  ;;  %v407_v6 = vcombine.high %v595_v4, %v595_v4  ;;  %296 = vrot.lane.b32.xlu0 %v595_v4, %s777_s17 }
  0x25   : > { %615 = vmatpush3.bf16.msra.mxu0 %v354_v7 }
  0x26   : > { %620 = vmatprep.subr.bf16.mxu0 %v773_v0 }
  0x28   : > { %410 = vrot.lane.b32.xlu1 %v407_v6, %s776_s16  ;;  %298 = vrot.lane.b32.xlu0 %v407_v6, %s777_s17  ;;  %s260_s16 = scalar_lea.vmem [#allocation3], %s586_s14 }
  0x29   : > { %617 = vmatmul.mubr.msk.bf16.vlgmr.msra.gmra.mrb[0].mxu0 %vm302_vm3, %v282_v8  ;;  %s492_s17 = sshll.u32 %s260_s16, 4  ;;  %s903_s17 = int_to_ptr.vmem [resolvable:$true] %s492_s17 }
  0x2a   : > { %622 = vmatprep.mubr.msk.bf16.mxu0 %vm774_vm0, %v773_v0  ;;  %s693_s7 = scalar_lea.vmem %s903_s17, 128  ;;  %p700_p1 = scmp.lt.s32.totalorder %s903_s17, %s698_s8 }
  0x2b   : > { %p694_p12 = scmp.ne.s32.totalorder %s903_s17, %s693_s7  ;;  %p701_p2 = scmp.lt.s32.totalorder %s699_s9, %s693_s7 }
  0x2c   : > { %464 = vperm.xlu0 %691, %v461_v9   ;;  %471 = vperm.xlu1 %692, %v468_v10  }
  0x2d   : > { %p695_p13 = pnand %p694_p12, %p849_p4  ;;  %p702_p3 = por %p701_p2, %p700_p1 }
  0x2f   : > { %p696_p0 = pneg %p695_p13 }
  0x31   : > { %p703_p5 = pnand %p702_p3, %p696_p0 }
  0x96   : > { %v409_v11 = vpop.permute.xlu1 %408  ;;  %v297_v12 = vpop.permute.xlu0 %296 }
  0x9a   : > { %v411_v13 = vpop.permute.xlu1 %410  ;;  %v299_v14 = vpop.permute.xlu0 %298 }
  0x9b   : > { %v413_v15 = vsel %vm412_vm4, %v409_v11, %v411_v13  ;;  %v301_v16 = vsel %vm300_vm5, %v297_v12, %v299_v14 }
  0x9c   : > { %v418_v17 = vsel %vm306_vm2, %v413_v15, 0  ;;  %v308_v18 = vsel %vm306_vm2, %v301_v16, 0 }
  0x9d   : > { %609 = vmatpush3.bf16.msra.mxu1 %v308_v18  ;;  %621 = vmatpush3.bf16.msra.mxu0 %v418_v17 }
  0xa0   : > { %611 = vmatmul.mubr.msk.bf16.vlgmr.msra.gmra.mrb[0].mxu1 %vm302_vm3, %v590_v19  ;;  %623 = vmatmul.mubr.msk.bf16.vlgmr.msra.gmra.mrb[0].mxu0 %vm302_vm3, %v594_v20 }
  0xab   : > { %v465_v21 = vpop.permute.xlu0 %464  ;;  %v472_v22 = vpop.permute.xlu1 %471 }
 0x173   : > { %v344_v23 = vpop.f32.mrb[0].mxu1  ;;  %v454_v24 = vpop.f32.mrb[0].mxu0 }
 0x174   : > { %v626_v25 = vadd.f32 %v454_v24, %v344_v23  ;;  %v624_v26 = vpop.f32.mrb[1].mxu0  ;;  %v612_v27 = vpop.f32.mrb[1].mxu1 }
 0x175   : > { %v457_v28 = vpop.f32.mrb[2].mxu0  ;;  %v347_v29 = vpop.f32.mrb[2].mxu1 }
 0x176   : > { %v467_v30 = vmul.f32 %v626_v25, %v465_v21  ;;  %v625_v31 = vpop.f32.mrb[3].mxu0  ;;  %v613_v32 = vpop.f32.mrb[3].mxu1 }
 0x178   : > { %v474_v33 = vadd.f32 %v472_v22, %v467_v30 }
 0x17a   : > { %v475_v34 = vmax.f32 %v474_v33, 0.0 }
 0x17c   : > { %476 = vst [vmem:[%s260_s16] sm:$0xff] %v475_v34 }
 0x17d   : > { %706 = shalt.err (!%p703_p5)
}
 0x17e   : > { %s707_s10 = scalar_lea.hbm %s901_s27, 128  ;;  %s711_s13 = scalar_lea.hbm %s953_s5, 256 }
 0x17f   : > { %p708_p6 = scmp.ne.s32.totalorder %s901_s27, %s707_s10  ;;  %p712_p10 = scmp.lt.u32.totalorder %s901_s27, %s953_s5 }
 0x180   : > { %p713_p11 = scmp.lt.u32.totalorder %s711_s13, %s707_s10  ;;  %p715_p13 = scmp.lt.u32.totalorder %s707_s10, %s901_s27 }
 0x181   : > { %p709_p7 = pnand %p708_p6, %p849_p4 }
 0x182   : > { %p714_p12 = por %p713_p11, %p712_p10 }
 0x183   : > { %p710_p9 = pneg %p709_p7 }
 0x184   : > { %p716_p0 = por %p715_p13, %p714_p12 }
 0x186   : > { %p717_p1 = pnand %p716_p0, %p710_p9 }
 0x188   : > { %720 = shalt.err (!%p717_p1)
}
 0x189   : > { %631 = dma.vmem_to_hbm [thread:$0]  (%p849_p4), %s903_s17, 128, %s901_s27, %s478_s29  }
 0x18a PF: > { %p637_p2 = scmp.ge.s32.totalorder %s771_s23, 2  ;;  %s504_s16 = sand.u32 1, %s751_s18  }
 0x18b   : > { %s505_s24 = scalar_lea.sflag [#allocation4], %s504_s16 }
 0x18c   : > { %p634_p3 = pnand %p637_p2, %p856_p8 }
 0x18e   : > { %746 = dma.done.wait (!%p634_p3), %s505_s24, 128  }
 0x18f   : > { %748 = vsyncadd (!%p634_p3), %s505_s24, 4294967168  ;;  %s18_s23 = sadd.s32 1, %s771_s23   ;;  %s956_s18 = smov %s755_s19 }
 0x190   : > { %p15_p5 = scmp.ge.s32.totalorder %s18_s23, 4   ;;  %s957_s19 = smov %s759_s20 }
 0x191   : > { %s958_s20 = smov %s862_s6  ;;  %s959_s21 = smov %s767_s22 }
 0x192   : > { %s960_s22 = smov %s962_s26  ;;  %17 = sbr.rel (!%p15_p5) target bundleno = 4 (0x4), region = 80 }
 0x199   :  { %510 = vsyncpa [#allocation4], 1 }
 0x19a   :  { %512 = vsyncpa [#allocation4 + $0x1], 1 }

// kernel: conv_batch_norm.2
= control target key start
LH: loop header
LB: loop body
LE: loop exit
PB: predicated region body
PF: predicated region fallthrough
CT: control target
= control target key end

     0   :  { %s714_s15 = smov 0   ;;  %s716_s16 = smov 0   ;;  %s788_s0 = inlined_call_operand.vmem [shape: bf16[3,8,4], index: 0, kind: input, shape index: {}]   ;;  %s789_s1 = inlined_call_operand.vmem [shape: bf16[2,4,256], index: 1, kind: input, shape index: {}]   ;;  %s790_s2 = inlined_call_operand.vmem [shape: bf16[2,1,4,2], index: 2, kind: input, shape index: {}]   ;;  %s791_s3 = inlined_call_operand.vmem [shape: f32[2,8,1], index: 3, kind: output, shape index: {0}]   ;;  %s792_s4 = inlined_call_operand.vmem [shape: f32[2,8,1], index: 4, kind: output, shape index: {1}]  }
   0x1   :  { %s718_s17 = smov 0  }
   0x2 LB: > { %s27_s18 = sadd.s32 1, %s679_s16  ;;  %p588_p0 = scmp.ge.s32.totalorder %s683_s17, 1  ;;  %s683_s17 = sphi %s718_s17, %s15_s17   ;;  %s679_s16 = sphi %s716_s16, %s794_s16   ;;  %s675_s15 = sphi %s714_s15, %s793_s15  }
   0x3   : > { %p29_p1 = scmp.ge.s32.totalorder %s27_s18, 2  ;;  %p196_p2 = scmp.lt.s32.totalorder %s683_s17, 3 }
   0x5   : > { %s796_s18 = smov (%p29_p1, %s27_s18), 0  ;;  %p197_p3 = pnand %p588_p0, %p196_p2 }
   0x6   : > { %p235_p4 = scmp.lt.s32.totalorder (!%p197_p3), %s675_s15, 1  ;;  %v685_v0 = vmov (!%p197_p3), 0.0   ;;  %vm686_vm0 = vmmov (!%p197_p3), 0   ;;  %vm269_vm1 = vcmask (!%p197_p3), 9216   ;;  %vm295_vm2 = vcmask (!%p197_p3), 1041408   ;;  %s687_s27 = smov (!%p197_p3), 126  }
   0x7   : > { %200 = sbr.rel (%p197_p3) target bundleno = 513 (0x201), region = 32  ;;  %616 = vmatprep.subr.bf16.mxu0 (!%p197_p3), %v685_v0  ;;  %618 = vmatprep.mubr.msk.bf16.mxu0 (!%p197_p3), %vm686_vm0, %v685_v0  ;;  %s688_s28 = smov (!%p197_p3), 127   ;;  %v271_v7 = vld [vmem:[%s788_s0] sm:$0xf] (!%p197_p3)  ;;  %vm291_vm3 = vcmask (!%p197_p3), 31744   ;;  %vm401_vm4 = vcmask (!%p197_p3), 1031168   ;;  %v451_v18 = vlaneseq (!%p197_p3) }
   0x8   : > { %610 = vmatprep.subr.bf16.mxu1 (!%p197_p3), %v685_v0  ;;  %612 = vmatprep.mubr.msk.bf16.mxu1 (!%p197_p3), %vm686_vm0, %v685_v0  ;;  %vm289_vm5 = vcmask (!%p197_p3), 1039360   ;;  %v594_v16 = vld [vmem:[%s788_s0 + $0x4] sm:$0xf] (!%p197_p3)  ;;  %v598_v17 = vld [vmem:[%s788_s0 + $0x8] sm:$0xf] (!%p197_p3)  ;;  %vm263_vm6 = vcmask (!%p197_p3), 7168  }
   0x9   : > { %v452_v19 = vand.u32 (!%p197_p3), 127, %v451_v18 }
   0xb   : > { %vm455_vm7 = vcmp.lt.s32.totalorder (!%p197_p3), %v452_v19, 16 }
   0xe   : > { %s798_s15 = smov (!%p235_p4, %s675_s15), 1 }
   0xf   : > { %s603_s19 = sshll.u32 %s798_s15, 2  ;;  %s591_s20 = sshll.u32 %s798_s15, 1 }
  0x10   : > { %s242_s23 = scalar_lea.vmem %s789_s1, %s603_s19  ;;  %s249_s26 = scalar_lea.vmem %s790_s2, %s591_s20 }
  0x11   : > { %v266_v1 = vld [vmem:[%s242_s23] sm:$0x3]  ;;  %s592_s9 = sshll.u32 %s798_s15, 3 }
  0x12   : > { %v268_v2 = vld [vmem:[%s249_s26] sm:$0x3]  ;;  %267 = vst [vmem:[#allocation2] sm:$0x3] %v266_v1  ;;  %s253_s12 = scalar_lea.vmem %s791_s3, %s592_s9  ;;  %s257_s15 = scalar_lea.vmem %s792_s4, %s592_s9 }
  0x13   : > { %270 = vst.msk [vmem:[#allocation2 + $0x2] sm:$0x3] %vm269_vm1, %v268_v2 }
  0x14   : > { %264 = vst.msk [vmem:[%s253_s12] sm:$0xff] %vm263_vm6, %v685_v0  ;;  %265 = vst.msk [vmem:[%s257_s15] sm:$0xff] %vm263_vm6, %v685_v0 }
  0x19   : > { %v272_v4 = vld [vmem:[#allocation2] sm:$0x3] }
  0x1a   : > { %v599_v3 = vld.sshfl [vmem:[#allocation2] sm:$0x33 pattern:$0x76325410]  ;;  %v343_v6 = vsel %vm295_vm2, %v272_v4, 0 }
  0x1b   : > { %397 = vrot.lane.b32.xlu1 %v599_v3, %s687_s27  ;;  %v396_v5 = vcombine.high %v599_v3, %v599_v3  ;;  %285 = vrot.lane.b32.xlu0 %v599_v3, %s688_s28  ;;  %v459_v31 = vld [vmem:[%s253_s12] sm:$0xff] }
  0x1c   : > { %617 = vmatpush3.bf16.msra.mxu0 %v343_v6  ;;  %v465_v33 = vld [vmem:[%s257_s15] sm:$0xff] }
  0x1d   : > { %622 = vmatprep.subr.bf16.mxu0 %v685_v0 }
  0x1f   : > { %399 = vrot.lane.b32.xlu1 %v396_v5, %s687_s27  ;;  %287 = vrot.lane.b32.xlu0 %v396_v5, %s688_s28 }
  0x20   : > { %619 = vmatmul.mubr.msk.bf16.vlgmr.msra.gmra.mrb[0].mxu0 %vm291_vm3, %v271_v7 }
  0x21   : > { %624 = vmatprep.mubr.msk.bf16.mxu0 %vm686_vm0, %v685_v0 }
  0x8d   : > { %v398_v8 = vpop.permute.xlu1 %397  ;;  %v286_v9 = vpop.permute.xlu0 %285 }
  0x91   : > { %v400_v10 = vpop.permute.xlu1 %399  ;;  %v288_v11 = vpop.permute.xlu0 %287 }
  0x92   : > { %v402_v12 = vsel %vm401_vm4, %v398_v8, %v400_v10  ;;  %v290_v13 = vsel %vm289_vm5, %v286_v9, %v288_v11 }
  0x93   : > { %v407_v14 = vsel %vm295_vm2, %v402_v12, 0  ;;  %v297_v15 = vsel %vm295_vm2, %v290_v13, 0 }
  0x94   : > { %611 = vmatpush3.bf16.msra.mxu1 %v297_v15  ;;  %623 = vmatpush3.bf16.msra.mxu0 %v407_v14 }
  0x97   : > { %613 = vmatmul.mubr.msk.bf16.vlgmr.msra.gmra.mrb[0].mxu1 %vm291_vm3, %v594_v16  ;;  %625 = vmatmul.mubr.msk.bf16.vlgmr.msra.gmra.mrb[0].mxu0 %vm291_vm3, %v598_v17 }
 0x16a   : > { %v333_v20 = vpop.f32.mrb[0].mxu1  ;;  %v443_v21 = vpop.f32.mrb[0].mxu0 }
 0x16b   : > { %v628_v22 = vadd.f32 %v443_v21, %v333_v20  ;;  %v626_v23 = vpop.f32.mrb[1].mxu0  ;;  %v614_v24 = vpop.f32.mrb[1].mxu1 }
 0x16c   : > { %v446_v25 = vpop.f32.mrb[2].mxu0  ;;  %v336_v26 = vpop.f32.mrb[2].mxu1 }
 0x16d   : > { %v627_v27 = vpop.f32.mrb[3].mxu0  ;;  %v458_v28 = vsel %vm455_vm7, %v628_v22, 0.0  ;;  %v615_v29 = vpop.f32.mrb[3].mxu1 }
 0x16e   : > { %460 = vadd.xlane.f32.xlu0 %v458_v28  ;;  %v466_v30 = vmul.f32 %v458_v28, %v458_v28 }
 0x170   : > { %467 = vadd.xlane.f32.xlu1 %v466_v30 }
 0x1fb   : > { %v461_v32 = vpop.xlane.xlu0 %460 }
 0x1fc   : > { %v462_v34 = vadd.f32 %v461_v32, %v459_v31 }
 0x1fd   : > { %v468_v35 = vpop.xlane.xlu1 %467 }
 0x1fe   : > { %464 = vst.msk [vmem:[%s253_s12] sm:$0xff] %vm263_vm6, %v462_v34  ;;  %v469_v36 = vadd.f32 %v468_v35, %v465_v33 }
 0x200   : > { %470 = vst.msk [vmem:[%s257_s15] sm:$0xff] %vm263_vm6, %v469_v36 }
 0x201 PF: > { %s15_s17 = sadd.s32 1, %s683_s17   ;;  %s793_s15 = smov %s679_s16 }
 0x202   : > { %p12_p5 = scmp.ge.s32.totalorder %s15_s17, 4   ;;  %s794_s16 = smov %s796_s18 }
 0x204   :  { %14 = sbr.rel (!%p12_p5) target bundleno = 2 (0x2), region = 83 }

</bundles_post_ra>
